<compile_context>
chip_gen: v7x
topology: tpu7x:2x2x1
jax: 0.10.0
libtpu: 0.0.40
codegen_flags: <defaults>
</compile_context>

<pallas_src>
import functools

import numpy as np
import jax
import jax.numpy as jnp
from jax import lax
from jax.experimental import pallas as pl
from jax.experimental.pallas import tpu as pltpu


def _dot_t(a, b):
    """a @ b.T with f32 accumulation on the MXU (contract last dims of both).

    The activation operand is cast to the weight dtype so the bf16 weight path
    (v6e/v7x) feeds the MXU bf16 x bf16 while accumulation stays f32.
    """
    return lax.dot_general(
        a.astype(b.dtype), b,
        dimension_numbers=(((1,), (1,)), ((), ())),
        preferred_element_type=jnp.float32,
    )


def _esn_block_kernel(x_ref, h0_ref, win_ref, wres_ref, wout_ref,
                      out_ref, hfinal_ref, h_scr, hall_scr, *, steps, batch):
    """One grid step == one block of `steps` timesteps. Weights stay VMEM-resident."""
    blk = pl.program_id(0)

    # Initialize the carried hidden state from h0 on the first time-block only.
    @pl.when(blk == 0)
    def _():
        h_scr[...] = h0_ref[...].astype(jnp.float32)

    # (1) Hoisted input projection: ONE (steps*batch, I) @ (I, R) matmul that actually
    #     fills the MXU, instead of `steps` tiny per-step launches.
    xproj = _dot_t(x_ref[...], win_ref[...])            # (steps*batch, R) f32

    # (2) The true recurrence: only the RxR matmul + tanh remain on the serial critical
    #     path.  `steps` is a small compile-time constant, so the loop is statically
    #     unrolled (the fully-static form of lax.fori_loop(..., unroll=True)), giving the
    #     LLO scheduler visibility across adjacent steps.
    h = h_scr[...]                                      # (batch, R) f32 carry
    for t in range(steps):
        pre = xproj[t * batch:(t + 1) * batch, :] + _dot_t(h, wres_ref[...])
        h = jnp.tanh(pre)
        hall_scr[t * batch:(t + 1) * batch, :] = h
    h_scr[...] = h

    # (3) Deferred readout: one (steps*batch, R) @ (R, O_pad) matmul and a single
    #     lane-dense, sublane-dense store per block (O_pad is a multiple of 128).
    out_ref[...] = _dot_t(hall_scr[...], wout_ref[...]).astype(out_ref.dtype)

    # Final hidden state written back exactly once, on the last block.
    @pl.when(blk == pl.num_programs(0) - 1)
    def _():
        hfinal_ref[...] = h.astype(hfinal_ref.dtype)


def _choose_time_block(T, B, I, R, O_pad, vmem_budget_bytes=8 << 20):
    """How many timesteps each grid step processes (whole rollout when it fits VMEM)."""
    per_step_bytes = 4 * B * (I + 2 * R + O_pad)        # x rows + h history + out rows
    if T * per_step_bytes <= vmem_budget_bytes:
        return T
    max_tb = max(1, vmem_budget_bytes // per_step_bytes)
    for tb in range(min(T, max_tb), 0, -1):
        # blocked (non-full) dims must stay (8, 128)-tile friendly
        if T % tb == 0 and (tb * B) % 8 == 0:
            return tb
    return T


def esn_rollout(x_seq, h0, w_in, w_res, w_out, *, weights_dtype=jnp.float32):
    """Fused T-step ESN rollout.

    Args:
      x_seq: (T, B, I) inputs.
      h0:    (R,), (1, R) or (B, R) initial hidden state (torch's self.h).
      w_in:  (R, I), w_res: (R, R), w_out: (O, R)  — torch Linear layout (out, in).
      weights_dtype: jnp.float32 (default) or jnp.bfloat16 (v6e/v7x MXU-native path);
        the recurrent state and all accumulation stay f32 either way.

    Returns:
      out_seq: (T, B, O), h_final: (B, R)
    """
    T, B, I = x_seq.shape
    R = w_res.shape[0]
    O = w_out.shape[0]

    # torch's self.h starts as an (R,) vector that broadcasts over batch; a per-batch
    # (1, R) / (B, R) state carried from a previous call is preserved as-is.
    h0 = jnp.asarray(h0, jnp.float32)
    if h0.ndim == 1:
        h0 = h0[None, :]
    h0_b = jnp.broadcast_to(h0, (B, R))

    # Lane-dense readout: pad output features up to a multiple of 128 (zeros).
    O_pad = ((O + 127) // 128) * 128
    wout_p = jnp.zeros((O_pad, R), jnp.float32).at[:O, :].set(w_out.astype(jnp.float32))

    win_k = w_in.astype(weights_dtype)
    wres_k = w_res.astype(weights_dtype)
    wout_k = wout_p.astype(weights_dtype)

    # Collapse time into (few) grid steps with an in-kernel unrolled loop.
    TB = _choose_time_block(T, B, I, R, O_pad)
    nb = T // TB
    x2d = x_seq.astype(jnp.float32).reshape(T * B, I)

    kernel = functools.partial(_esn_block_kernel, steps=TB, batch=B)

    grid_spec = pltpu.PrefetchScalarGridSpec(
        num_scalar_prefetch=0,
        grid=(nb,),
        in_specs=[
            pl.BlockSpec((TB * B, I), lambda b: (b, 0)),      # x block (streamed)
            pl.BlockSpec((B, R), lambda b: (0, 0)),           # h0        (resident)
            pl.BlockSpec((R, I), lambda b: (0, 0)),           # W_in      (resident)
            pl.BlockSpec((R, R), lambda b: (0, 0)),           # W_res     (resident)
            pl.BlockSpec((O_pad, R), lambda b: (0, 0)),       # W_out     (resident)
        ],
        out_specs=[
            pl.BlockSpec((TB * B, O_pad), lambda b: (b, 0)),  # per-block readout
            pl.BlockSpec((B, R), lambda b: (0, 0)),           # final hidden state
        ],
        scratch_shapes=[
            pltpu.VMEM((B, R), jnp.float32),                  # carried hidden state
            pltpu.VMEM((TB * B, R), jnp.float32),             # per-block h history
        ],
    )

    cost = pl.CostEstimate(
        flops=2 * T * B * (I * R + R * R + R * O),
        transcendentals=T * B * R,
        bytes_accessed=4 * (T * B * I + B * R + R * I + R * R + O_pad * R
                            + T * B * O_pad + B * R),
    )

    out_pad, h_final = pl.pallas_call(
        kernel,
        grid_spec=grid_spec,
        out_shape=(
            jax.ShapeDtypeStruct((T * B, O_pad), jnp.float32),
            jax.ShapeDtypeStruct((B, R), jnp.float32),
        ),
        compiler_params=pltpu.CompilerParams(
            dimension_semantics=("arbitrary",),   # true recurrence over time blocks
        ),
        cost_estimate=cost,
    )(x2d, h0_b, win_k, wres_k, wout_k)

    # NOTE: consumers that can eat the padded (.., O_pad) tensor should do so and skip
    # this HBM->HBM slice; negligible at demo size.
    out_seq = out_pad.reshape(T, B, O_pad)[:, :, :O]
    return out_seq, h_final


def esn_forward(x, h, w_in, w_res, w_out):
    """Single torch-style forward step (API parity with ESN.forward): x (B, I)."""
    out_seq, h_new = esn_rollout(x[None], h, w_in, w_res, w_out)
    return out_seq[0], h_new


def init_esn_params(key, input_size, reservoir_size, output_size, spectral_radius=0.9):
    """Deterministic re-implementation of ESN.init_weight()."""
    k1, k2, k3 = jax.random.split(key, 3)
    w_in = jax.random.uniform(
        k1, (reservoir_size, input_size), minval=-0.1, maxval=0.1, dtype=jnp.float32)
    w_res = 0.1 * jax.random.normal(
        k2, (reservoir_size, reservoir_size), dtype=jnp.float32)
    # Spectral-radius rescale (eigvals on host with numpy; init-time glue only).
    rho = float(np.max(np.abs(np.linalg.eigvals(np.asarray(w_res)))))
    w_res = w_res * (spectral_radius / rho)
    w_out = jax.random.normal(k3, (output_size, reservoir_size), dtype=jnp.float32)
    return w_in, w_res, w_out


if __name__ == "__main__":
    # Lorenz-system sizes from the original module.
    input_size = 3
    reservoir_size = 32
    output_size = 3
    batch = 2
    T = 8

    key = jax.random.PRNGKey(0)
    kx, kp = jax.random.split(key)

    w_in, w_res, w_out = init_esn_params(
        kp, input_size, reservoir_size, output_size, spectral_radius=0.9)

    x_seq = jax.random.normal(kx, (T, batch, input_size), dtype=jnp.float32)
    h0 = jnp.zeros((reservoir_size,), dtype=jnp.float32)   # self.h = zeros(R)

    out_seq, h_final = esn_rollout(x_seq, h0, w_in, w_res, w_out)
    out_seq = jax.block_until_ready(out_seq)
    h_final = jax.block_until_ready(h_final)

    # --- pure-numpy (float64) reference for the whole rollout ---
    w_in64 = np.asarray(w_in, np.float64)
    w_res64 = np.asarray(w_res, np.float64)
    w_out64 = np.asarray(w_out, np.float64)
    x64 = np.asarray(x_seq, np.float64)
    h_ref = np.zeros((batch, reservoir_size), np.float64)
    outs_ref = []
    for t in range(T):
        h_ref = np.tanh(x64[t] @ w_in64.T + h_ref @ w_res64.T)
        outs_ref.append(h_ref @ w_out64.T)
    outs_ref = np.stack(outs_ref)

    np.testing.assert_allclose(np.asarray(out_seq), outs_ref, rtol=1e-4, atol=1e-4)
    np.testing.assert_allclose(np.asarray(h_final), h_ref, rtol=1e-4, atol=1e-4)

    # Sanity-check the single-step (torch forward()) entry point.
    out1, h1 = esn_forward(x_seq[0], h0, w_in, w_res, w_out)
    out1 = jax.block_until_ready(out1)
    np.testing.assert_allclose(np.asarray(out1), outs_ref[0], rtol=1e-4, atol=1e-4)

    # Per-batch (B, R) initial state must be preserved (previous version collapsed it).
    h_mid = jnp.asarray(h_ref[:, :], dtype=jnp.float32)     # distinct rows per batch
    out_c, h_c = esn_rollout(x_seq, h_mid, w_in, w_res, w_out)
    out_c = jax.block_until_ready(out_c)
    h_ref2 = np.asarray(h_mid, np.float64)
    outs_ref2 = []
    for t in range(T):
        h_ref2 = np.tanh(x64[t] @ w_in64.T + h_ref2 @ w_res64.T)
        outs_ref2.append(h_ref2 @ w_out64.T)
    np.testing.assert_allclose(np.asarray(out_c), np.stack(outs_ref2), rtol=1e-4, atol=1e-4)

    # Optional bf16 weight path (v6e/v7x): weight quantization only, so compare against
    # the f32 kernel output at a loose tolerance.
    out_bf, h_bf = esn_rollout(x_seq, h0, w_in, w_res, w_out,
                               weights_dtype=jnp.bfloat16)
    out_bf = jax.block_until_ready(out_bf)
    np.testing.assert_allclose(np.asarray(out_bf), np.asarray(out_seq),
                               rtol=0.0, atol=0.25)

    print("KERNEL_OK")
</pallas_src>

<mosaic_0001>
module attributes {stable_mosaic.version = 11 : i64} {
  func.func @_esn_block_kernel(%arg0: i32, %arg1: memref<16x3xf32, #tpu.memory_space<vmem>>, %arg2: memref<2x32xf32, #tpu.memory_space<vmem>>, %arg3: memref<32x3xf32, #tpu.memory_space<vmem>>, %arg4: memref<32x32xf32, #tpu.memory_space<vmem>>, %arg5: memref<128x32xf32, #tpu.memory_space<vmem>>, %arg6: memref<16x128xf32, #tpu.memory_space<vmem>>, %arg7: memref<2x32xf32, #tpu.memory_space<vmem>>, %arg8: memref<2x32xf32, #tpu.memory_space<vmem>>, %arg9: memref<16x32xf32, #tpu.memory_space<vmem>>) attributes {dimension_semantics = [#tpu.dimension_semantics<arbitrary>], iteration_bounds = array<i64: 1>, scalar_prefetch = 0 : i64, scratch_operands = 2 : i64, tpu.core_type = #tpu.core_type<tc>, window_params = [{transform_indices = @transform_0, window_bounds = array<i64: 16, 3>}, {pipeline_mode = #tpu.pipeline_mode<synchronous>, transform_indices = @transform_1, window_bounds = array<i64: 2, 32>}, {pipeline_mode = #tpu.pipeline_mode<synchronous>, transform_indices = @transform_2, window_bounds = array<i64: 32, 3>}, {pipeline_mode = #tpu.pipeline_mode<synchronous>, transform_indices = @transform_3, window_bounds = array<i64: 32, 32>}, {pipeline_mode = #tpu.pipeline_mode<synchronous>, transform_indices = @transform_4, window_bounds = array<i64: 128, 32>}, {transform_indices = @transform_5, window_bounds = array<i64: 16, 128>}, {pipeline_mode = #tpu.pipeline_mode<synchronous>, transform_indices = @transform_6, window_bounds = array<i64: 2, 32>}]} {
    %c0_i32 = arith.constant 0 : i32
    %0 = arith.cmpi eq, %arg0, %c0_i32 : i32
    %1 = arith.extui %0 : i1 to i32
    %c0_i32_0 = arith.constant 0 : i32
    %2 = arith.cmpi ne, %1, %c0_i32_0 : i32
    scf.if %2 {
      %c0_50 = arith.constant 0 : index
      %c0_51 = arith.constant 0 : index
      %63 = vector.load %arg2[%c0_50, %c0_51] : memref<2x32xf32, #tpu.memory_space<vmem>>, vector<2x32xf32>
      %c0_52 = arith.constant 0 : index
      %c0_53 = arith.constant 0 : index
      %64 = vector.load %arg8[%c0_52, %c0_53] : memref<2x32xf32, #tpu.memory_space<vmem>>, vector<2x32xf32>
      tpu.vector_store %arg8[%c0_52, %c0_53], %63 {strides = array<i32>} : memref<2x32xf32, #tpu.memory_space<vmem>>, vector<2x32xf32>,
    } else {
    }
    %c0 = arith.constant 0 : index
    %c0_1 = arith.constant 0 : index
    %3 = vector.load %arg1[%c0, %c0_1] : memref<16x3xf32, #tpu.memory_space<vmem>>, vector<16x3xf32>
    %c0_2 = arith.constant 0 : index
    %c0_3 = arith.constant 0 : index
    %4 = vector.load %arg3[%c0_2, %c0_3] : memref<32x3xf32, #tpu.memory_space<vmem>>, vector<32x3xf32>
    %cst = arith.constant dense<0.000000e+00> : vector<16x32xf32>
    %5 = tpu.matmul %3, %4, %cst {dimension_numbers = #tpu.dot_dimension_numbers<[1], [1], [0], [0], [0, 0, 1, 0], [], []>} : vector<16x3xf32>, vector<32x3xf32>, vector<16x32xf32> -> vector<16x32xf32>
    %c0_4 = arith.constant 0 : index
    %c0_5 = arith.constant 0 : index
    %6 = vector.load %arg8[%c0_4, %c0_5] : memref<2x32xf32, #tpu.memory_space<vmem>>, vector<2x32xf32>
    %7 = vector.extract_strided_slice %5 {offsets = [0, 0], sizes = [2, 32], strides = [1, 1]} : vector<16x32xf32> to vector<2x32xf32>
    %c0_6 = arith.constant 0 : index
    %c0_7 = arith.constant 0 : index
    %8 = vector.load %arg4[%c0_6, %c0_7] : memref<32x32xf32, #tpu.memory_space<vmem>>, vector<32x32xf32>
    %cst_8 = arith.constant dense<0.000000e+00> : vector<2x32xf32>
    %9 = tpu.matmul %6, %8, %cst_8 {dimension_numbers = #tpu.dot_dimension_numbers<[1], [1], [0], [0], [0, 0, 1, 0], [], []>} : vector<2x32xf32>, vector<32x32xf32>, vector<2x32xf32> -> vector<2x32xf32>
    %10 = arith.addf %7, %9 : vector<2x32xf32>
    %11 = math.tanh %10 : vector<2x32xf32>
    %c0_9 = arith.constant 0 : index
    %c0_10 = arith.constant 0 : index
    %12 = vector.load %arg9[%c0_9, %c0_10] : memref<16x32xf32, #tpu.memory_space<vmem>>, vector<2x32xf32>
    tpu.vector_store %arg9[%c0_9, %c0_10], %11 {strides = array<i32>} : memref<16x32xf32, #tpu.memory_space<vmem>>, vector<2x32xf32>,
    %13 = vector.extract_strided_slice %5 {offsets = [2, 0], sizes = [2, 32], strides = [1, 1]} : vector<16x32xf32> to vector<2x32xf32>
    %c0_11 = arith.constant 0 : index
    %c0_12 = arith.constant 0 : index
    %14 = vector.load %arg4[%c0_11, %c0_12] : memref<32x32xf32, #tpu.memory_space<vmem>>, vector<32x32xf32>
    %cst_13 = arith.constant dense<0.000000e+00> : vector<2x32xf32>
    %15 = tpu.matmul %11, %14, %cst_13 {dimension_numbers = #tpu.dot_dimension_numbers<[1], [1], [0], [0], [0, 0, 1, 0], [], []>} : vector<2x32xf32>, vector<32x32xf32>, vector<2x32xf32> -> vector<2x32xf32>
    %16 = arith.addf %13, %15 : vector<2x32xf32>
    %17 = math.tanh %16 : vector<2x32xf32>
    %c2 = arith.constant 2 : index
    %c0_14 = arith.constant 0 : index
    %18 = vector.load %arg9[%c2, %c0_14] : memref<16x32xf32, #tpu.memory_space<vmem>>, vector<2x32xf32>
    tpu.vector_store %arg9[%c2, %c0_14], %17 {strides = array<i32>} : memref<16x32xf32, #tpu.memory_space<vmem>>, vector<2x32xf32>,
    %19 = vector.extract_strided_slice %5 {offsets = [4, 0], sizes = [2, 32], strides = [1, 1]} : vector<16x32xf32> to vector<2x32xf32>
    %c0_15 = arith.constant 0 : index
    %c0_16 = arith.constant 0 : index
    %20 = vector.load %arg4[%c0_15, %c0_16] : memref<32x32xf32, #tpu.memory_space<vmem>>, vector<32x32xf32>
    %cst_17 = arith.constant dense<0.000000e+00> : vector<2x32xf32>
    %21 = tpu.matmul %17, %20, %cst_17 {dimension_numbers = #tpu.dot_dimension_numbers<[1], [1], [0], [0], [0, 0, 1, 0], [], []>} : vector<2x32xf32>, vector<32x32xf32>, vector<2x32xf32> -> vector<2x32xf32>
    %22 = arith.addf %19, %21 : vector<2x32xf32>
    %23 = math.tanh %22 : vector<2x32xf32>
    %c4 = arith.constant 4 : index
    %c0_18 = arith.constant 0 : index
    %24 = vector.load %arg9[%c4, %c0_18] : memref<16x32xf32, #tpu.memory_space<vmem>>, vector<2x32xf32>
    tpu.vector_store %arg9[%c4, %c0_18], %23 {strides = array<i32>} : memref<16x32xf32, #tpu.memory_space<vmem>>, vector<2x32xf32>,
    %25 = vector.extract_strided_slice %5 {offsets = [6, 0], sizes = [2, 32], strides = [1, 1]} : vector<16x32xf32> to vector<2x32xf32>
    %c0_19 = arith.constant 0 : index
    %c0_20 = arith.constant 0 : index
    %26 = vector.load %arg4[%c0_19, %c0_20] : memref<32x32xf32, #tpu.memory_space<vmem>>, vector<32x32xf32>
    %cst_21 = arith.constant dense<0.000000e+00> : vector<2x32xf32>
    %27 = tpu.matmul %23, %26, %cst_21 {dimension_numbers = #tpu.dot_dimension_numbers<[1], [1], [0], [0], [0, 0, 1, 0], [], []>} : vector<2x32xf32>, vector<32x32xf32>, vector<2x32xf32> -> vector<2x32xf32>
    %28 = arith.addf %25, %27 : vector<2x32xf32>
    %29 = math.tanh %28 : vector<2x32xf32>
    %c6 = arith.constant 6 : index
    %c0_22 = arith.constant 0 : index
    %30 = vector.load %arg9[%c6, %c0_22] : memref<16x32xf32, #tpu.memory_space<vmem>>, vector<2x32xf32>
    tpu.vector_store %arg9[%c6, %c0_22], %29 {strides = array<i32>} : memref<16x32xf32, #tpu.memory_space<vmem>>, vector<2x32xf32>,
    %31 = vector.extract_strided_slice %5 {offsets = [8, 0], sizes = [2, 32], strides = [1, 1]} : vector<16x32xf32> to vector<2x32xf32>
    %c0_23 = arith.constant 0 : index
    %c0_24 = arith.constant 0 : index
    %32 = vector.load %arg4[%c0_23, %c0_24] : memref<32x32xf32, #tpu.memory_space<vmem>>, vector<32x32xf32>
    %cst_25 = arith.constant dense<0.000000e+00> : vector<2x32xf32>
    %33 = tpu.matmul %29, %32, %cst_25 {dimension_numbers = #tpu.dot_dimension_numbers<[1], [1], [0], [0], [0, 0, 1, 0], [], []>} : vector<2x32xf32>, vector<32x32xf32>, vector<2x32xf32> -> vector<2x32xf32>
    %34 = arith.addf %31, %33 : vector<2x32xf32>
    %35 = math.tanh %34 : vector<2x32xf32>
    %c8 = arith.constant 8 : index
    %c0_26 = arith.constant 0 : index
    %36 = vector.load %arg9[%c8, %c0_26] : memref<16x32xf32, #tpu.memory_space<vmem>>, vector<2x32xf32>
    tpu.vector_store %arg9[%c8, %c0_26], %35 {strides = array<i32>} : memref<16x32xf32, #tpu.memory_space<vmem>>, vector<2x32xf32>,
    %37 = vector.extract_strided_slice %5 {offsets = [10, 0], sizes = [2, 32], strides = [1, 1]} : vector<16x32xf32> to vector<2x32xf32>
    %c0_27 = arith.constant 0 : index
    %c0_28 = arith.constant 0 : index
    %38 = vector.load %arg4[%c0_27, %c0_28] : memref<32x32xf32, #tpu.memory_space<vmem>>, vector<32x32xf32>
    %cst_29 = arith.constant dense<0.000000e+00> : vector<2x32xf32>
    %39 = tpu.matmul %35, %38, %cst_29 {dimension_numbers = #tpu.dot_dimension_numbers<[1], [1], [0], [0], [0, 0, 1, 0], [], []>} : vector<2x32xf32>, vector<32x32xf32>, vector<2x32xf32> -> vector<2x32xf32>
    %40 = arith.addf %37, %39 : vector<2x32xf32>
    %41 = math.tanh %40 : vector<2x32xf32>
    %c10 = arith.constant 10 : index
    %c0_30 = arith.constant 0 : index
    %42 = vector.load %arg9[%c10, %c0_30] : memref<16x32xf32, #tpu.memory_space<vmem>>, vector<2x32xf32>
    tpu.vector_store %arg9[%c10, %c0_30], %41 {strides = array<i32>} : memref<16x32xf32, #tpu.memory_space<vmem>>, vector<2x32xf32>,
    %43 = vector.extract_strided_slice %5 {offsets = [12, 0], sizes = [2, 32], strides = [1, 1]} : vector<16x32xf32> to vector<2x32xf32>
    %c0_31 = arith.constant 0 : index
    %c0_32 = arith.constant 0 : index
    %44 = vector.load %arg4[%c0_31, %c0_32] : memref<32x32xf32, #tpu.memory_space<vmem>>, vector<32x32xf32>
    %cst_33 = arith.constant dense<0.000000e+00> : vector<2x32xf32>
    %45 = tpu.matmul %41, %44, %cst_33 {dimension_numbers = #tpu.dot_dimension_numbers<[1], [1], [0], [0], [0, 0, 1, 0], [], []>} : vector<2x32xf32>, vector<32x32xf32>, vector<2x32xf32> -> vector<2x32xf32>
    %46 = arith.addf %43, %45 : vector<2x32xf32>
    %47 = math.tanh %46 : vector<2x32xf32>
    %c12 = arith.constant 12 : index
    %c0_34 = arith.constant 0 : index
    %48 = vector.load %arg9[%c12, %c0_34] : memref<16x32xf32, #tpu.memory_space<vmem>>, vector<2x32xf32>
    tpu.vector_store %arg9[%c12, %c0_34], %47 {strides = array<i32>} : memref<16x32xf32, #tpu.memory_space<vmem>>, vector<2x32xf32>,
    %49 = vector.extract_strided_slice %5 {offsets = [14, 0], sizes = [2, 32], strides = [1, 1]} : vector<16x32xf32> to vector<2x32xf32>
    %c0_35 = arith.constant 0 : index
    %c0_36 = arith.constant 0 : index
    %50 = vector.load %arg4[%c0_35, %c0_36] : memref<32x32xf32, #tpu.memory_space<vmem>>, vector<32x32xf32>
    %cst_37 = arith.constant dense<0.000000e+00> : vector<2x32xf32>
    %51 = tpu.matmul %47, %50, %cst_37 {dimension_numbers = #tpu.dot_dimension_numbers<[1], [1], [0], [0], [0, 0, 1, 0], [], []>} : vector<2x32xf32>, vector<32x32xf32>, vector<2x32xf32> -> vector<2x32xf32>
    %52 = arith.addf %49, %51 : vector<2x32xf32>
    %53 = math.tanh %52 : vector<2x32xf32>
    %c14 = arith.constant 14 : index
    %c0_38 = arith.constant 0 : index
    %54 = vector.load %arg9[%c14, %c0_38] : memref<16x32xf32, #tpu.memory_space<vmem>>, vector<2x32xf32>
    tpu.vector_store %arg9[%c14, %c0_38], %53 {strides = array<i32>} : memref<16x32xf32, #tpu.memory_space<vmem>>, vector<2x32xf32>,
    %c0_39 = arith.constant 0 : index
    %c0_40 = arith.constant 0 : index
    %55 = vector.load %arg8[%c0_39, %c0_40] : memref<2x32xf32, #tpu.memory_space<vmem>>, vector<2x32xf32>
    tpu.vector_store %arg8[%c0_39, %c0_40], %53 {strides = array<i32>} : memref<2x32xf32, #tpu.memory_space<vmem>>, vector<2x32xf32>,
    %c0_41 = arith.constant 0 : index
    %c0_42 = arith.constant 0 : index
    %56 = vector.load %arg9[%c0_41, %c0_42] : memref<16x32xf32, #tpu.memory_space<vmem>>, vector<16x32xf32>
    %c0_43 = arith.constant 0 : index
    %c0_44 = arith.constant 0 : index
    %57 = vector.load %arg5[%c0_43, %c0_44] : memref<128x32xf32, #tpu.memory_space<vmem>>, vector<128x32xf32>
    %cst_45 = arith.constant dense<0.000000e+00> : vector<16x128xf32>
    %58 = tpu.matmul %56, %57, %cst_45 {dimension_numbers = #tpu.dot_dimension_numbers<[1], [1], [0], [0], [0, 0, 1, 0], [], []>} : vector<16x32xf32>, vector<128x32xf32>, vector<16x128xf32> -> vector<16x128xf32>
    %c0_46 = arith.constant 0 : index
    %c0_47 = arith.constant 0 : index
    %59 = vector.load %arg6[%c0_46, %c0_47] : memref<16x128xf32, #tpu.memory_space<vmem>>, vector<16x128xf32>
    tpu.vector_store %arg6[%c0_46, %c0_47], %58 {strides = array<i32>} : memref<16x128xf32, #tpu.memory_space<vmem>>, vector<16x128xf32>,
    %c0_i32_48 = arith.constant 0 : i32
    %60 = arith.cmpi eq, %arg0, %c0_i32_48 : i32
    %61 = arith.extui %60 : i1 to i32
    %c0_i32_49 = arith.constant 0 : i32
    %62 = arith.cmpi ne, %61, %c0_i32_49 : i32
    scf.if %62 {
      %c0_50 = arith.constant 0 : index
      %c0_51 = arith.constant 0 : index
      %63 = vector.load %arg7[%c0_50, %c0_51] : memref<2x32xf32, #tpu.memory_space<vmem>>, vector<2x32xf32>
      tpu.vector_store %arg7[%c0_50, %c0_51], %53 {strides = array<i32>} : memref<2x32xf32, #tpu.memory_space<vmem>>, vector<2x32xf32>,
    } else {
    }
    return
  }
  func.func @transform_0(%arg0: i32) -> (i32, i32) {
    %c0_i32 = arith.constant 0 : i32
    %c0_i32_0 = arith.constant 0 : i32
    return %arg0, %c0_i32 : i32, i32
  }
  func.func @transform_1(%arg0: i32) -> (i32, i32) {
    %c0_i32 = arith.constant 0 : i32
    %c0_i32_0 = arith.constant 0 : i32
    %c0_i32_1 = arith.constant 0 : i32
    return %c0_i32, %c0_i32_0 : i32, i32
  }
  func.func @transform_2(%arg0: i32) -> (i32, i32) {
    %c0_i32 = arith.constant 0 : i32
    %c0_i32_0 = arith.constant 0 : i32
    %c0_i32_1 = arith.constant 0 : i32
    return %c0_i32, %c0_i32_0 : i32, i32
  }
  func.func @transform_3(%arg0: i32) -> (i32, i32) {
    %c0_i32 = arith.constant 0 : i32
    %c0_i32_0 = arith.constant 0 : i32
    %c0_i32_1 = arith.constant 0 : i32
    return %c0_i32, %c0_i32_0 : i32, i32
  }
  func.func @transform_4(%arg0: i32) -> (i32, i32) {
    %c0_i32 = arith.constant 0 : i32
    %c0_i32_0 = arith.constant 0 : i32
    %c0_i32_1 = arith.constant 0 : i32
    return %c0_i32, %c0_i32_0 : i32, i32
  }
  func.func @transform_5(%arg0: i32) -> (i32, i32) {
    %c0_i32 = arith.constant 0 : i32
    %c0_i32_0 = arith.constant 0 : i32
    return %arg0, %c0_i32 : i32, i32
  }
  func.func @transform_6(%arg0: i32) -> (i32, i32) {
    %c0_i32 = arith.constant 0 : i32
    %c0_i32_0 = arith.constant 0 : i32
    %c0_i32_1 = arith.constant 0 : i32
    return %c0_i32, %c0_i32_0 : i32, i32
  }
}

</mosaic_0001>

<bundles_post_ra>
// kernel: tpu_custom_call.1
= control target key start
LH: loop header
LB: loop body
LE: loop exit
PB: predicated region body
PF: predicated region fallthrough
CT: control target
= control target key end

     0   :  { %12 = vsyncpa [#allocation5], 0  ;;  %vm37_vm0 = vcmask 23552   ;;  %vm136_vm1 = vcmask 261120   ;;  %v1537_v7 = vmov 0.0|0.0   ;;  %vm29_vm3 = vcmask 254976   ;;  %s1849_s0 = inlined_call_operand.vmem [shape: f32[16,3], index: 0, kind: input, shape index: {}]   ;;  %s1850_s1 = inlined_call_operand.vmem [shape: f32[2,32], index: 1, kind: input, shape index: {}]   ;;  %s1851_s2 = inlined_call_operand.vmem [shape: f32[32,3], index: 2, kind: input, shape index: {}]   ;;  %s1852_s3 = inlined_call_operand.vmem [shape: f32[32,32], index: 3, kind: input, shape index: {}]   ;;  %s1853_s4 = inlined_call_operand.vmem [shape: f32[128,32], index: 4, kind: input, shape index: {}]   ;;  %s1854_s5 = inlined_call_operand.hbm [shape: f32[16,128], index: 5, kind: output, shape index: {0}]   ;;  %s1855_s6 = inlined_call_operand.hbm [shape: f32[2,32], index: 6, kind: output, shape index: {1}]  }
   0x1   :  { %v33_v0 = vld [vmem:[%s1851_s2] sm:$0xff]  ;;  %v34_v1 = vld [vmem:[%s1851_s2 + $0x8] sm:$0xff]  ;;  %v35_v2 = vld [vmem:[%s1851_s2 + $0x10] sm:$0xff]  ;;  %1370 = vmatprep.subr.bf16.mxu1 %v1537_v7  ;;  %vm1538_vm4 = vmmov 0   ;;  %v1539_v11 = vmov 0.0  }
   0x2   :  { %v1342_v3 = vpack.c.bf16 %v34_v1, %v33_v0  ;;  %vm1590_vm2 = vmpackc.low %vm37_vm0, %vm37_vm0  ;;  %v36_v5 = vld [vmem:[%s1851_s2 + $0x18] sm:$0xff]  ;;  %v31_v6 = vld [vmem:[%s1849_s0] sm:$0xff]  ;;  %1249 = vmatprep.mubr.msk.f32.mxu1 %vm1538_vm4, %v1539_v11 }
   0x3   :  { %v1348_v8 = vpack.c.bf16 %v36_v5, %v35_v2  ;;  %1216 = vmatprep.mubr.msk.f32.mxu0 %vm37_vm0, %v31_v6  ;;  %v132_v9 = vld [vmem:[%s1852_s3] sm:$0xff]  ;;  %v133_v10 = vld [vmem:[%s1852_s3 + $0x8] sm:$0xff]  ;;  %vm1616_vm5 = vmpackc.low %vm136_vm1, %vm136_vm1 }
   0x4   :  { %1344 = vmatprep.subr.msk.bf16.mxu0 %vm1590_vm2, %v1342_v3  ;;  %v1612_v12 = vpack.c.bf16 %v133_v10, %v132_v9  ;;  %v28_v14 = vld [vmem:[%s1850_s1] sm:$0x3] }
   0x5   :  { %1347 = vmatpush3.bf16.xpose.msk.msra.mxu0 %vm1590_vm2, %v1342_v3 }
   0x6   :  { %13 = vsyncpa [#allocation7], 0  ;;  %1350 = vmatprep.subr.msk.bf16.mxu0 %vm1590_vm2, %v1348_v8  ;;  %30 = vst.msk [vmem:[#allocation2] sm:$0x3] %vm29_vm3, %v28_v14  ;;  %1373 = vmatpush3.bf16.xpose.msk.msra.mxu1 %vm1616_vm5, %v1612_v12  ;;  %v134_v15 = vld [vmem:[%s1852_s3 + $0x10] sm:$0xff]  ;;  %v135_v16 = vld [vmem:[%s1852_s3 + $0x18] sm:$0xff] }
   0x7   :  { %1374 = vmatprep.subr.bf16.mxu1 %v1537_v7  ;;  %v1638_v17 = vpack.c.bf16 %v135_v16, %v134_v15  ;;  %v32_v18 = vld [vmem:[%s1849_s0 + $0x8] sm:$0xff]  ;;  %vm320_vm6 = vcmask 257026   ;;  %vm417_vm7 = vcmask 259076   ;;  %vm514_vm8 = vcmask 261126   ;;  %v899_v55 = vld [vmem:[%s1853_s4] sm:$0xff]  ;;  %v901_v57 = vld [vmem:[%s1853_s4 + $0x10] sm:$0xff] }
   0x8   :  { %v900_v56 = vld [vmem:[%s1853_s4 + $0x8] sm:$0xff]  ;;  %v902_v59 = vld [vmem:[%s1853_s4 + $0x18] sm:$0xff]  ;;  %v903_v61 = vld [vmem:[%s1853_s4 + $0x20] sm:$0xff] }
   0x9   :  { %v1418_v58 = vpack.c.bf16 %v900_v56, %v899_v55  ;;  %v1424_v60 = vpack.c.bf16 %v902_v59, %v901_v57  ;;  %v904_v62 = vld [vmem:[%s1853_s4 + $0x28] sm:$0xff]  ;;  %v905_v0 = vld [vmem:[%s1853_s4 + $0x30] sm:$0xff]  ;;  %v906_v1 = vld [vmem:[%s1853_s4 + $0x38] sm:$0xff] }
   0xa   :  { %v1430_v63 = vpack.c.bf16 %v904_v62, %v903_v61  ;;  %v1436_v2 = vpack.c.bf16 %v906_v1, %v905_v0  ;;  %v907_v3 = vld [vmem:[%s1853_s4 + $0x40] sm:$0xff]  ;;  %v908_v4 = vld [vmem:[%s1853_s4 + $0x48] sm:$0xff]  ;;  %v910_v14 = vld [vmem:[%s1853_s4 + $0x58] sm:$0xff] }
   0xb   :  { %v1442_v5 = vpack.c.bf16 %v908_v4, %v907_v3  ;;  %v911_v16 = vld [vmem:[%s1853_s4 + $0x60] sm:$0xff] }
   0xd   :  { %1353 = vmatpush3.bf16.xpose.msk.msra.mxu0 %vm1590_vm2, %v1348_v8  ;;  %v131_v19 = vld [vmem:[#allocation2] sm:$0x3] }
   0xe   :  { %1354 = vmatprep.subr.bf16.mxu0 %v1537_v7  ;;  %1377 = vmatpush3.bf16.xpose.msk.msra.mxu1 %vm1616_vm5, %v1638_v17 }
   0xf   :  { %1386 = vmatprep.subr.bf16.mxu1 %v1537_v7 }
  0x14   :  { %1217 = vmatmul.mubr.msk.f32.vlgmr.msra.gmra.mrb[0].mxu0 %vm37_vm0, %v32_v18 }
  0x15   :  { %1357 = vmatpush3.bf16.xpose.msk.msra.mxu0 %vm1616_vm5, %v1612_v12  ;;  %1227 = vmatprep.mubr.msk.f32.mxu0 %vm1538_vm4, %v1539_v11 }
  0x16   :  { %1358 = vmatprep.subr.bf16.mxu0 %v1537_v7 }
  0x1d   :  { %1361 = vmatpush3.bf16.xpose.msk.msra.mxu0 %vm1616_vm5, %v1638_v17 }
  0x1e   :  { %1362 = vmatprep.subr.bf16.mxu0 %v1537_v7 }
  0x24   :  { %1228 = vmatmul.mubr.msk.f32.vlgmr.msra.gmra.mrb[2].mxu0 %vm136_vm1, %v131_v19  ;;  %v913_v19 = vld [vmem:[%s1853_s4 + $0x70] sm:$0xff] }
  0x25   :  { %1365 = vmatpush3.bf16.xpose.msk.msra.mxu0 %vm1616_vm5, %v1612_v12  ;;  %1238 = vmatprep.mubr.msk.f32.mxu0 %vm1538_vm4, %v1539_v11 }
  0x26   :  { %1366 = vmatprep.subr.bf16.mxu0 %v1537_v7 }
  0x2d   :  { %1369 = vmatpush3.bf16.xpose.msk.msra.mxu0 %vm1616_vm5, %v1638_v17 }
  0x2e   :  { %1378 = vmatprep.subr.bf16.mxu0 %v1537_v7 }
  0xe7   :  { %v1672_v20 = vpop.f32.mrb[0].mxu0 }
  0xe8   :  { %v122_v21 = vpop.f32.mrb[1].mxu0 }
  0xf7   :  { %v218_v22 = vpop.f32.mrb[2].mxu0 }
  0xf8   :  { %v222_v23 = vadd.f32 %v218_v22, %v122_v21  ;;  %v1229_v24 = vpop.f32.mrb[3].mxu0 }
  0xfa   :  { %1473 = vtanh.f32 %v222_v23 }
 0x104   :  { %v1474_v25 = vpop.eup %1473 }
 0x105   :  { %225 = vst.msk [vmem:[#allocation3] sm:$0x3] %vm29_vm3, %v1474_v25  ;;  %1239 = vmatmul.mubr.msk.f32.vlgmr.msra.gmra.mrb[4].mxu0 %vm136_vm1, %v1474_v25 }
 0x106   :  { %1381 = vmatpush3.bf16.xpose.msk.msra.mxu0 %vm1616_vm5, %v1612_v12  ;;  %1260 = vmatprep.mubr.msk.f32.mxu0 %vm1538_vm4, %v1539_v11 }
 0x107   :  { %1382 = vmatprep.subr.bf16.mxu0 %v1537_v7 }
 0x10e   :  { %1385 = vmatpush3.bf16.xpose.msk.msra.mxu0 %vm1616_vm5, %v1638_v17 }
 0x10f   :  { %1394 = vmatprep.subr.bf16.mxu0 %v1537_v7 }
 0x1d8   :  { %v311_v26 = vpop.f32.mrb[4].mxu0 }
 0x1d9   :  { %v316_v27 = vrot.slane %v311_v26, 6  ;;  %v1240_v28 = vpop.f32.mrb[5].mxu0 }
 0x1db   :  { %v318_v29 = vadd.f32 %v316_v27, %v122_v21 }
 0x1dd   :  { %1475 = vtanh.f32 %v318_v29 }
 0x1e7   :  { %v1476_v30 = vpop.eup %1475 }
 0x1e8   :  { %321 = vst.msk [vmem:[#allocation3] sm:$0xc] %vm320_vm6, %v1476_v30  ;;  %v327_v31 = vrot.slane %v1476_v30, 2 }
 0x1ea   :  { %1250 = vmatmul.mubr.msk.f32.vlgmr.msra.gmra.mrb[0].mxu1 %vm136_vm1, %v327_v31 }
 0x1eb   :  { %1389 = vmatpush3.bf16.xpose.msk.msra.mxu1 %vm1616_vm5, %v1612_v12  ;;  %1271 = vmatprep.mubr.msk.f32.mxu1 %vm1538_vm4, %v1539_v11 }
 0x1ec   :  { %1390 = vmatprep.subr.bf16.mxu1 %v1537_v7 }
 0x1f3   :  { %1393 = vmatpush3.bf16.xpose.msk.msra.mxu1 %vm1616_vm5, %v1638_v17 }
 0x1f4   :  { %1402 = vmatprep.subr.bf16.mxu1 %v1537_v7 }
 0x2bd   :  { %v408_v32 = vpop.f32.mrb[0].mxu1 }
 0x2be   :  { %v413_v33 = vrot.slane %v408_v32, 4  ;;  %v1251_v34 = vpop.f32.mrb[1].mxu1 }
 0x2c0   :  { %v415_v35 = vadd.f32 %v413_v33, %v122_v21 }
 0x2c2   :  { %1477 = vtanh.f32 %v415_v35 }
 0x2cc   :  { %v1478_v36 = vpop.eup %1477 }
 0x2cd   :  { %418 = vst.msk [vmem:[#allocation3] sm:$0x30] %vm417_vm7, %v1478_v36  ;;  %v424_v37 = vrot.slane %v1478_v36, 4 }
 0x2cf   :  { %1261 = vmatmul.mubr.msk.f32.vlgmr.msra.gmra.mrb[6].mxu0 %vm136_vm1, %v424_v37 }
 0x2d0   :  { %1397 = vmatpush3.bf16.xpose.msk.msra.mxu0 %vm1616_vm5, %v1612_v12  ;;  %1282 = vmatprep.mubr.msk.f32.mxu0 %vm1538_vm4, %v1539_v11 }
 0x2d1   :  { %1398 = vmatprep.subr.bf16.mxu0 %v1537_v7 }
 0x2d8   :  { %1401 = vmatpush3.bf16.xpose.msk.msra.mxu0 %vm1616_vm5, %v1638_v17 }
 0x2d9   :  { %1410 = vmatprep.subr.bf16.mxu0 %v1537_v7 }
 0x3a2   :  { %v505_v38 = vpop.f32.mrb[6].mxu0 }
 0x3a3   :  { %v510_v39 = vrot.slane %v505_v38, 2  ;;  %v1262_v40 = vpop.f32.mrb[7].mxu0 }
 0x3a5   :  { %v512_v41 = vadd.f32 %v510_v39, %v122_v21  ;;  %v914_v21 = vld [vmem:[%s1853_s4 + $0x78] sm:$0xff] }
 0x3a6   :  { %v1460_v22 = vpack.c.bf16 %v914_v21, %v913_v19 }
 0x3a7   :  { %1479 = vtanh.f32 %v512_v41 }
 0x3b1   :  { %v1480_v42 = vpop.eup %1479 }
 0x3b2   :  { %515 = vst.msk [vmem:[#allocation3] sm:$0xc0] %vm514_vm8, %v1480_v42  ;;  %v521_v43 = vrot.slane %v1480_v42, 6 }
 0x3b4   :  { %1272 = vmatmul.mubr.msk.f32.vlgmr.msra.gmra.mrb[2].mxu1 %vm136_vm1, %v521_v43 }
 0x3b5   :  { %1405 = vmatpush3.bf16.xpose.msk.msra.mxu1 %vm1616_vm5, %v1612_v12  ;;  %1293 = vmatprep.mubr.msk.f32.mxu1 %vm1538_vm4, %v1539_v11 }
 0x3b6   :  { %1406 = vmatprep.subr.bf16.mxu1 %v1537_v7 }
 0x3b9   :  { %v897_v54 = vld [vmem:[#allocation3] sm:$0xff] }
 0x3bd   :  { %1409 = vmatpush3.bf16.xpose.msk.msra.mxu1 %vm1616_vm5, %v1638_v17 }
 0x3be   :  { %1420 = vmatprep.subr.msk.bf16.mxu1 %vm1616_vm5, %v1418_v58 }
 0x487   :  { %v602_v44 = vpop.f32.mrb[2].mxu1 }
 0x488   :  { %v606_v45 = vadd.f32 %v1672_v20, %v602_v44  ;;  %v1273_v46 = vpop.f32.mrb[3].mxu1 }
 0x48a   :  { %1481 = vtanh.f32 %v606_v45 }
 0x494   :  { %v1482_v47 = vpop.eup %1481 }
 0x495   :  { %608 = vst.msk [vmem:[#allocation3 + $0x8] sm:$0x3] %vm29_vm3, %v1482_v47  ;;  %1283 = vmatmul.mubr.msk.f32.vlgmr.msra.gmra.mrb[8].mxu0 %vm136_vm1, %v1482_v47 }
 0x496   :  { %1413 = vmatpush3.bf16.xpose.msk.msra.mxu0 %vm1616_vm5, %v1612_v12  ;;  %1304 = vmatprep.mubr.msk.f32.mxu0 %vm1538_vm4, %v1539_v11  ;;  %v909_v12 = vld [vmem:[%s1853_s4 + $0x50] sm:$0xff] }
 0x497   :  { %1414 = vmatprep.subr.bf16.mxu0 %v1537_v7  ;;  %v1448_v15 = vpack.c.bf16 %v910_v14, %v909_v12 }
 0x49e   :  { %1417 = vmatpush3.bf16.xpose.msk.msra.mxu0 %vm1616_vm5, %v1638_v17  ;;  %v912_v17 = vld [vmem:[%s1853_s4 + $0x68] sm:$0xff]  ;;  %s1540_s4 = smov [#allocation6]  }
 0x49f   :  { %v1454_v18 = vpack.c.bf16 %v912_v17, %v911_v16  ;;  %s1068_s19 = sshll.u32 %s1540_s4, 4  ;;  %s1069_s19 = int_to_ptr.vmem [resolvable:$true] %s1068_s19 }
 0x4a0   :  { %s1489_s20 = scalar_lea.vmem %s1069_s19, 32  ;;  %p1494_p1 = scmp.lt.s32.totalorder %s1069_s19, %s1069_s19 }
 0x4a1   :  { %p1490_p0 = scmp.ne.s32.totalorder %s1069_s19, %s1489_s20  ;;  %p1495_p2 = scmp.lt.s32.totalorder %s1489_s20, %s1489_s20 }
 0x4a3   :  { %p1496_p3 = por %p1495_p2, %p1494_p1 }
 0x4a5   :  { %p1497_p4 = pnand %p1496_p3, %p1490_p0 }
 0x568   :  { %v694_v48 = vpop.f32.mrb[8].mxu0 }
 0x569   :  { %v699_v49 = vrot.slane %v694_v48, 6  ;;  %v1284_v50 = vpop.f32.mrb[9].mxu0 }
 0x56b   :  { %v701_v51 = vadd.f32 %v1672_v20, %v699_v49 }
 0x56d   :  { %1483 = vtanh.f32 %v701_v51 }
 0x577   :  { %v1484_v52 = vpop.eup %1483 }
 0x578   :  { %703 = vst.msk [vmem:[#allocation3 + $0x8] sm:$0xc] %vm320_vm6, %v1484_v52  ;;  %v709_v53 = vrot.slane %v1484_v52, 2 }
 0x57a   :  { %1294 = vmatmul.mubr.msk.f32.vlgmr.msra.gmra.mrb[4].mxu1 %vm136_vm1, %v709_v53 }
 0x57b   :  { %1339 = vmatprep.mubr.msk.f32.mxu1 %vm136_vm1, %v897_v54  ;;  %1423 = vmatpush3.bf16.xpose.msk.msra.mxu1 %vm1616_vm5, %v1418_v58 }
 0x57c   :  { %1426 = vmatprep.subr.msk.bf16.mxu1 %vm1616_vm5, %v1424_v60 }
 0x583   :  { %1429 = vmatpush3.bf16.xpose.msk.msra.mxu1 %vm1616_vm5, %v1424_v60 }
 0x584   :  { %1432 = vmatprep.subr.msk.bf16.mxu1 %vm1616_vm5, %v1430_v63 }
 0x58b   :  { %1435 = vmatpush3.bf16.xpose.msk.msra.mxu1 %vm1616_vm5, %v1430_v63 }
 0x58c   :  { %1438 = vmatprep.subr.msk.bf16.mxu1 %vm1616_vm5, %v1436_v2 }
 0x593   :  { %1441 = vmatpush3.bf16.xpose.msk.msra.mxu1 %vm1616_vm5, %v1436_v2 }
 0x594   :  { %1444 = vmatprep.subr.msk.bf16.mxu1 %vm1616_vm5, %v1442_v5 }
 0x59b   :  { %1447 = vmatpush3.bf16.xpose.msk.msra.mxu1 %vm1616_vm5, %v1442_v5 }
 0x59c   :  { %1450 = vmatprep.subr.msk.bf16.mxu1 %vm1616_vm5, %v1448_v15 }
 0x5a3   :  { %1453 = vmatpush3.bf16.xpose.msk.msra.mxu1 %vm1616_vm5, %v1448_v15 }
 0x5a4   :  { %1456 = vmatprep.subr.msk.bf16.mxu1 %vm1616_vm5, %v1454_v18 }
 0x5ab   :  { %1459 = vmatpush3.bf16.xpose.msk.msra.mxu1 %vm1616_vm5, %v1454_v18 }
 0x5ac   :  { %1462 = vmatprep.subr.msk.bf16.mxu1 %vm1616_vm5, %v1460_v22 }
 0x5b3   :  { %1465 = vmatpush3.bf16.xpose.msk.msra.mxu1 %vm1616_vm5, %v1460_v22 }
 0x64d   :  { %v790_v6 = vpop.f32.mrb[4].mxu1 }
 0x64e   :  { %v795_v7 = vrot.slane %v790_v6, 4  ;;  %v1295_v8 = vpop.f32.mrb[5].mxu1 }
 0x650   :  { %v797_v9 = vadd.f32 %v1672_v20, %v795_v7 }
 0x652   :  { %1485 = vtanh.f32 %v797_v9 }
 0x65c   :  { %v1486_v10 = vpop.eup %1485 }
 0x65d   :  { %799 = vst.msk [vmem:[#allocation3 + $0x8] sm:$0x30] %vm417_vm7, %v1486_v10  ;;  %v805_v11 = vrot.slane %v1486_v10, 4 }
 0x65f   :  { %1305 = vmatmul.mubr.msk.f32.vlgmr.msra.gmra.mrb[10].mxu0 %vm136_vm1, %v805_v11 }
 0x732   :  { %v886_v23 = vpop.f32.mrb[10].mxu0 }
 0x733   :  { %v891_v24 = vrot.slane %v886_v23, 2  ;;  %v1306_v25 = vpop.f32.mrb[11].mxu0 }
 0x735   :  { %v893_v26 = vadd.f32 %v1672_v20, %v891_v24 }
 0x737   :  { %1487 = vtanh.f32 %v893_v26 }
 0x741   :  { %v1488_v27 = vpop.eup %1487 }
 0x742   :  { %895 = vst.msk [vmem:[#allocation3 + $0x8] sm:$0xc0] %vm514_vm8, %v1488_v27  ;;  %896 = vst.msk [vmem:[#allocation2 - $0x6] sm:$0xc0] %vm514_vm8, %v1488_v27 }
 0x743   :  { %1049 = vst.msk [vmem:[#allocation6 - $0x6] sm:$0xc0] %vm514_vm8, %v1488_v27 }
 0x749   :  { %v898_v28 = vld [vmem:[#allocation3 + $0x8] sm:$0xff] }
 0x74a   :  { %1340 = vmatmul.mubr.msk.f32.vlgmr.msra.gmra.mrb[6].mxu1 %vm136_vm1, %v898_v28 }
 0x74b   :  { %1500 = shalt.err (!%p1497_p4)
}
 0x74c   :  { %s1501_s23 = scalar_lea.hbm %s1855_s6, 32 }
 0x74d   :  { %p1502_p5 = scmp.ne.s32.totalorder %s1855_s6, %s1501_s23  ;;  %p1505_p6 = scmp.lt.u32.totalorder %s1501_s23, %s1855_s6 }
 0x74f   :  { %p1507_p7 = pnand %p1505_p6, %p1502_p5 }
 0x751   :  { %1510 = shalt.err (!%p1507_p7)
}
 0x752   :  { %1071 = dma.vmem_to_hbm [thread:$0]  %s1069_s19, 32, %s1855_s6, [#allocation7]  }
 0x753   :  { %s1541_s30 = smov [#allocation4]  }
 0x754   :  { %s1055_s7 = sshll.u32 %s1541_s30, 4  ;;  %s1056_s7 = int_to_ptr.vmem [resolvable:$true] %s1055_s7 }
 0x755   :  { %s1511_s8 = scalar_lea.vmem %s1056_s7, 256  ;;  %p1516_p9 = scmp.lt.s32.totalorder %s1056_s7, %s1056_s7 }
 0x756   :  { %p1512_p8 = scmp.ne.s32.totalorder %s1056_s7, %s1511_s8  ;;  %p1517_p10 = scmp.lt.s32.totalorder %s1511_s8, %s1511_s8 }
 0x758   :  { %p1518_p11 = por %p1517_p10, %p1516_p9 }
 0x75a   :  { %p1519_p12 = pnand %p1518_p11, %p1512_p8 }
 0x81d   :  { %v1341_v13 = vpop.f32.mrb[6].mxu1 }
 0x81e   :  { %1045 = vst [vmem:[#allocation4 + $0x8] sm:$0xff] %v1341_v13  ;;  %v1035_v20 = vpop.f32.mrb[7].mxu1 }
 0x81f   :  { %1044 = vst [vmem:[#allocation4] sm:$0xff] %v1035_v20 }
 0x820   :  { %1522 = shalt.err (!%p1519_p12)
}
 0x821   :  { %s1523_s2 = scalar_lea.hbm %s1854_s5, 256 }
 0x822   :  { %p1524_p13 = scmp.ne.s32.totalorder %s1854_s5, %s1523_s2  ;;  %p1527_p0 = scmp.lt.u32.totalorder %s1523_s2, %s1854_s5 }
 0x824   :  { %p1529_p1 = pnand %p1527_p0, %p1524_p13 }
 0x826   :  { %1532 = shalt.err (!%p1529_p1)
}
 0x827   :  { %s1542_s14 = smov 128   ;;  %s1543_s15 = smov 8  }
 0x828   :  { %1061 = dma.vmem_to_hbm [thread:$0]  %s1056_s7, 256, %s1854_s5, [#allocation5], %s1542_s14, %s1542_s14, %s1543_s15  }
 0x829   :  { %1533 = dma.done.wait [#allocation5], 256  }
 0x82a   :  { %1534 = vsyncadd [#allocation5], 4294967040 }
 0x82b   :  { %1535 = dma.done.wait [#allocation7], 32  }
 0x82c   :  { %1536 = vsyncadd [#allocation7], 4294967264 }
 0x82d   :  { %1078 = vsyncpa [#allocation5], 1 }
 0x82e   :  { %1079 = vsyncpa [#allocation7], 1 }

</bundles_post_ra>
